<compile_context>
chip_gen: v5e
topology: v5e:2x2
jax: 0.10.0
libtpu: 0.0.40
codegen_flags: <defaults>
</compile_context>

<pallas_src>
import math

import jax
import jax.numpy as jnp
from jax.experimental import pallas as pl
from jax.experimental.pallas import tpu as pltpu

LN_EPS = 1e-5
INV_SQRT2 = 0.7071067811865475


def token_mixer_kernel(x_ref, gamma_ref, beta_ref, w1t_ref, b1_ref,
                       w2t_ref, b2_ref, o_ref, xn_ref):
    """One grid step: `nb` batch elements merged onto the lane axis.

    x_ref / o_ref : (S, nb*D)  caller dtype
    gamma / beta  : (1, D)     f32
    w1t           : (H, S)     bf16 (= W1^T)
    b1            : (H, 1)     f32
    w2t           : (S, H)     bf16 (= W2^T)
    b2            : (S, 1)     f32
    xn_ref        : (S, nb*D)  bf16 VMEM scratch (LayerNorm output = matmul rhs)
    """
    D = gamma_ref.shape[-1]
    nb = x_ref.shape[-1] // D
    gamma = gamma_ref[...]
    beta = beta_ref[...]

    # ---- LayerNorm over token_dim: one D-wide lane chunk per batch element ----
    # Single-pass stats (E[x^2] - mean^2, clamped at 0), f32 math; bf16 result is
    # written straight into the scratch so per-chunk live ranges stay bounded.
    for j in range(nb):
        lo = j * D
        xc = x_ref[:, lo:lo + D].astype(jnp.float32)              # (S, D)
        m = jnp.mean(xc, axis=-1, keepdims=True)
        var = jnp.maximum(jnp.mean(xc * xc, axis=-1, keepdims=True) - m * m, 0.0)
        xn = (xc - m) * jax.lax.rsqrt(var + LN_EPS) * gamma + beta
        xn_ref[:, lo:lo + D] = xn.astype(xn_ref.dtype)

    # ---- token-mixing MLP: two wide MXU matmuls, N = nb*D lanes ----
    g = jnp.dot(w1t_ref[...], xn_ref[...],
                preferred_element_type=jnp.float32) + b1_ref[...]   # (H, nb*D)
    # exact erf GELU (matches nn.GELU() default)
    g = 0.5 * g * (1.0 + jax.lax.erf(g * INV_SQRT2))
    # TODO(synk): nn.Dropout is identity in eval mode; training-mode dropout
    # (pltpu.prng_random_bits mask) intentionally omitted.
    y = jnp.dot(w2t_ref[...], g.astype(jnp.bfloat16),
                preferred_element_type=jnp.float32) + b2_ref[...]   # (S, nb*D)

    # ---- residual add + single lane-dense store ----
    o_ref[...] = (x_ref[...].astype(jnp.float32) + y).astype(o_ref.dtype)


def _vmem_budget_bytes():
    """Generation-aware scoped-VMEM budget with headroom (48 MiB v7x, ~96 MiB v5e/v6e)."""
    try:
        cap = int(pltpu.get_tpu_info().vmem_capacity_bytes)
    except Exception:  # CPU tracing / older jax: assume the smallest (v7x) capacity.
        cap = 64 * 1024 * 1024
    return max(32 * 1024 * 1024, min((cap * 3) // 4, cap - 16 * 1024 * 1024))


def _vmem_bytes(nb, S, D, H, x_itemsize):
    tile = S * nb * D
    return (2 * 2 * tile * x_itemsize          # in + out tiles, double-buffered
            + tile * 2                          # bf16 LayerNorm scratch
            + 2 * H * S * 2                     # bf16 W1^T + W2^T (single-buffered)
            + (H + S + 2 * D) * 4               # biases + gamma/beta
            + (H * nb * D + 2 * tile) * 4)      # f32 g / y / residual working set


def _lane_group(D):
    """Smallest nb such that nb*D is a multiple of 128 (lane-dense blocks)."""
    return 128 // math.gcd(D, 128)


def _auto_batch_tile(B, S, D, H, x_itemsize, budget, group):
    if B <= 1:
        return 1
    best = 0
    cand = group
    cap = max(64, group)
    while cand <= cap:
        if pl.cdiv(B, cand) < 2:   # keep >= 2 grid steps (v7x megacore / pipelining)
            break
        if _vmem_bytes(cand, S, D, H, x_itemsize) > budget:
            break
        best = cand
        cand += group
    if best:
        return best
    # No lane-aligned tile with >= 2 blocks fits: use one block spanning the whole
    # batch (block extent == array extent, so the 128-lane rule does not apply).
    if _vmem_bytes(B, S, D, H, x_itemsize) <= budget:
        return B
    return group


def token_mixer(x, gamma, beta, w1, b1, w2, b2, *, batch_tile=None):
    """TokenMixer forward (eval mode).

    x : (batch, num_tokens, token_dim)
    w1: (num_tokens, hidden), b1: (hidden,), w2: (hidden, num_tokens), b2: (num_tokens,)
    (JAX y = x @ W convention, i.e. transpose of the nn.Linear weight.)
    """
    B, S, D = x.shape
    H = w1.shape[1]
    assert w1.shape == (S, H) and w2.shape == (H, S)
    x_itemsize = jnp.dtype(x.dtype).itemsize

    budget = _vmem_budget_bytes()
    group = _lane_group(D)
    if batch_tile is None:
        nb = _auto_batch_tile(B, S, D, H, x_itemsize, budget, group)
    else:
        nb = int(batch_tile)
    # Legality / lane-density: a block narrower than the array must have a
    # 128-multiple lane width; otherwise round up (or collapse to one block).
    if nb >= B:
        nb = B
    elif (nb * D) % 128 != 0:
        nb = min(B, -(-nb // group) * group)

    num_blocks = pl.cdiv(B, nb)
    Bp = num_blocks * nb
    x_in = jnp.pad(x, ((0, Bp - B), (0, 0), (0, 0))) if Bp != B else x

    # Fold batch onto the lane axis: (B, S, D) -> (S, B*D).  Each grid step then
    # runs ONE (H,S)@(S,nb*D) and ONE (S,H)@(H,nb*D) matmul + one lane-dense store.
    xT = jnp.swapaxes(x_in, 0, 1).reshape(S, Bp * D)

    gamma2 = gamma.reshape(1, D).astype(jnp.float32)
    beta2 = beta.reshape(1, D).astype(jnp.float32)
    w1t = jnp.asarray(w1.T, dtype=jnp.bfloat16)     # (H, S)
    b1c = b1.reshape(H, 1).astype(jnp.float32)
    w2t = jnp.asarray(w2.T, dtype=jnp.bfloat16)     # (S, H)
    b2c = b2.reshape(S, 1).astype(jnp.float32)

    vmem_limit = int(budget)

    def build(single_buffer_invariants):
        inv = ({"pipeline_mode": pl.Buffered(buffer_count=1)}
               if single_buffer_invariants else {})
        return pl.pallas_call(
            token_mixer_kernel,
            out_shape=jax.ShapeDtypeStruct((S, Bp * D), x.dtype),
            grid_spec=pltpu.PrefetchScalarGridSpec(
                num_scalar_prefetch=0,
                grid=(num_blocks,),
                in_specs=[
                    pl.BlockSpec((S, nb * D), lambda b: (0, b)),       # x slab
                    pl.BlockSpec((1, D), lambda b: (0, 0), **inv),     # gamma
                    pl.BlockSpec((1, D), lambda b: (0, 0), **inv),     # beta
                    pl.BlockSpec((H, S), lambda b: (0, 0), **inv),     # W1^T
                    pl.BlockSpec((H, 1), lambda b: (0, 0), **inv),     # b1
                    pl.BlockSpec((S, H), lambda b: (0, 0), **inv),     # W2^T
                    pl.BlockSpec((S, 1), lambda b: (0, 0), **inv),     # b2
                ],
                out_specs=pl.BlockSpec((S, nb * D), lambda b: (0, b)),
                scratch_shapes=[pltpu.VMEM((S, nb * D), jnp.bfloat16)],
            ),
            compiler_params=pltpu.CompilerParams(
                dimension_semantics=("parallel",),
                vmem_limit_bytes=vmem_limit,
            ),
        )

    args = (xT, gamma2, beta2, w1t, b1c, w2t, b2c)
    try:
        out2 = build(True)(*args)
    except (pltpu.LoweringException, NotImplementedError, TypeError, ValueError):
        # Narrow fallback for jax versions whose TPU pipeliner rejects
        # pl.Buffered(1) on grid-invariant blocks; identical math, just default
        # double-buffering of the (small) invariant operands.
        out2 = build(False)(*args)

    out = jnp.swapaxes(out2.reshape(S, Bp, D), 0, 1)
    return out[:B] if Bp != B else out


def reference(x, gamma, beta, w1, b1, w2, b2):
    """Pure-JAX f32 reference of the TokenMixer forward (eval mode)."""
    mean = jnp.mean(x, axis=-1, keepdims=True)
    var = jnp.mean((x - mean) ** 2, axis=-1, keepdims=True)
    xn = (x - mean) / jnp.sqrt(var + LN_EPS) * gamma + beta
    xt = jnp.swapaxes(xn, 1, 2)                       # (B, D, S)
    h = xt @ w1 + b1                                  # (B, D, H)
    h = 0.5 * h * (1.0 + jax.lax.erf(h * INV_SQRT2))
    y = h @ w2 + b2                                   # (B, D, S)
    return x + jnp.swapaxes(y, 1, 2)


if __name__ == "__main__":
    def make_case(key, batch, num_tokens, token_dim, hidden_dim):
        kx, kg, kb, k1, k2 = jax.random.split(key, 5)
        x = jax.random.normal(kx, (batch, num_tokens, token_dim), jnp.float32)
        gamma = 1.0 + 0.1 * jax.random.normal(kg, (token_dim,), jnp.float32)
        beta = 0.1 * jax.random.normal(kb, (token_dim,), jnp.float32)
        w1 = jax.random.normal(k1, (num_tokens, hidden_dim), jnp.float32) * 0.02
        b1 = 0.01 * jnp.ones((hidden_dim,), jnp.float32)
        w2 = jax.random.normal(k2, (hidden_dim, num_tokens), jnp.float32) * 0.02
        b2 = 0.01 * jnp.ones((num_tokens,), jnp.float32)
        return x, gamma, beta, w1, b1, w2, b2

    key = jax.random.PRNGKey(0)
    ka, kb_, kc = jax.random.split(key, 3)

    # 1) Small default shapes, auto batch_tile (single full-width block).
    args = make_case(ka, batch=2, num_tokens=8, token_dim=32, hidden_dim=64)
    out = jax.block_until_ready(token_mixer(*args))
    ref = reference(*args)
    assert out.shape == args[0].shape
    assert jnp.allclose(out, ref, atol=5e-3, rtol=5e-3), float(jnp.max(jnp.abs(out - ref)))

    # 2) 128-multiple token_dim, explicit batch_tile, padded batch tail (2 grid steps).
    args = make_case(kb_, batch=3, num_tokens=8, token_dim=128, hidden_dim=32)
    out = jax.block_until_ready(token_mixer(*args, batch_tile=2))
    ref = reference(*args)
    assert out.shape == args[0].shape
    assert jnp.allclose(out, ref, atol=5e-3, rtol=5e-3), float(jnp.max(jnp.abs(out - ref)))

    # 3) Auto batch_tile with lane-group rounding (D=32 -> nb multiple of 4, 2 blocks).
    args = make_case(kc, batch=8, num_tokens=16, token_dim=32, hidden_dim=64)
    out = jax.block_until_ready(token_mixer(*args))
    ref = reference(*args)
    assert out.shape == args[0].shape
    assert jnp.allclose(out, ref, atol=5e-3, rtol=5e-3), float(jnp.max(jnp.abs(out - ref)))

    print("KERNEL_OK")
</pallas_src>

<mosaic_0001>
module attributes {stable_mosaic.version = 11 : i64} {
  func.func @token_mixer_kernel(%arg0: i32, %arg1: memref<8x64xf32, #tpu.memory_space<vmem>>, %arg2: memref<1x32xf32, #tpu.memory_space<vmem>>, %arg3: memref<1x32xf32, #tpu.memory_space<vmem>>, %arg4: memref<64x8xbf16, #tpu.memory_space<vmem>>, %arg5: memref<64x1xf32, #tpu.memory_space<vmem>>, %arg6: memref<8x64xbf16, #tpu.memory_space<vmem>>, %arg7: memref<8x1xf32, #tpu.memory_space<vmem>>, %arg8: memref<8x64xf32, #tpu.memory_space<vmem>>, %arg9: memref<8x64xbf16, #tpu.memory_space<vmem>>) attributes {dimension_semantics = [#tpu.dimension_semantics<parallel>], iteration_bounds = array<i64: 1>, scalar_prefetch = 0 : i64, scratch_operands = 1 : i64, tpu.core_type = #tpu.core_type<tc>, window_params = [{transform_indices = @transform_0, window_bounds = array<i64: 8, 64>}, {pipeline_mode = #tpu.pipeline_mode<synchronous>, transform_indices = @transform_1, window_bounds = array<i64: 1, 32>}, {pipeline_mode = #tpu.pipeline_mode<synchronous>, transform_indices = @transform_2, window_bounds = array<i64: 1, 32>}, {pipeline_mode = #tpu.pipeline_mode<synchronous>, transform_indices = @transform_3, window_bounds = array<i64: 64, 8>}, {pipeline_mode = #tpu.pipeline_mode<synchronous>, transform_indices = @transform_4, window_bounds = array<i64: 64, 1>}, {pipeline_mode = #tpu.pipeline_mode<synchronous>, transform_indices = @transform_5, window_bounds = array<i64: 8, 64>}, {pipeline_mode = #tpu.pipeline_mode<synchronous>, transform_indices = @transform_6, window_bounds = array<i64: 8, 1>}, {transform_indices = @transform_7, window_bounds = array<i64: 8, 64>}]} {
    %c0 = arith.constant 0 : index
    %c0_0 = arith.constant 0 : index
    %0 = vector.load %arg2[%c0, %c0_0] : memref<1x32xf32, #tpu.memory_space<vmem>>, vector<1x32xf32>
    %c0_1 = arith.constant 0 : index
    %c0_2 = arith.constant 0 : index
    %1 = vector.load %arg3[%c0_1, %c0_2] : memref<1x32xf32, #tpu.memory_space<vmem>>, vector<1x32xf32>
    %c0_3 = arith.constant 0 : index
    %c0_4 = arith.constant 0 : index
    %2 = vector.load %arg1[%c0_3, %c0_4] : memref<8x64xf32, #tpu.memory_space<vmem>>, vector<8x32xf32>
    %cst = arith.constant dense<0.000000e+00> : vector<8xf32>
    %3 = vector.multi_reduction <add>, %2, %cst [1] : vector<8x32xf32> to vector<8xf32>
    %4 = vector.shape_cast %3 : vector<8xf32> to vector<8x1xf32>
    %cst_5 = arith.constant 3.200000e+01 : f32
    %5 = vector.broadcast %cst_5 : f32 to vector<8x1xf32>
    %6 = arith.divf %4, %5 : vector<8x1xf32>
    %7 = arith.mulf %2, %2 : vector<8x32xf32>
    %cst_6 = arith.constant dense<0.000000e+00> : vector<8xf32>
    %8 = vector.multi_reduction <add>, %7, %cst_6 [1] : vector<8x32xf32> to vector<8xf32>
    %9 = vector.shape_cast %8 : vector<8xf32> to vector<8x1xf32>
    %cst_7 = arith.constant 3.200000e+01 : f32
    %10 = vector.broadcast %cst_7 : f32 to vector<8x1xf32>
    %11 = arith.divf %9, %10 : vector<8x1xf32>
    %12 = arith.mulf %6, %6 : vector<8x1xf32>
    %13 = arith.subf %11, %12 : vector<8x1xf32>
    %cst_8 = arith.constant 0.000000e+00 : f32
    %14 = vector.broadcast %cst_8 : f32 to vector<8x1xf32>
    %15 = arith.maximumf %13, %14 : vector<8x1xf32>
    %16 = vector.broadcast %6 : vector<8x1xf32> to vector<8x32xf32>
    %17 = arith.subf %2, %16 : vector<8x32xf32>
    %cst_9 = arith.constant 9.99999974E-6 : f32
    %18 = vector.broadcast %cst_9 : f32 to vector<8x1xf32>
    %19 = arith.addf %15, %18 : vector<8x1xf32>
    %20 = math.rsqrt %19 : vector<8x1xf32>
    %21 = vector.broadcast %20 : vector<8x1xf32> to vector<8x32xf32>
    %22 = arith.mulf %17, %21 : vector<8x32xf32>
    %23 = vector.broadcast %0 : vector<1x32xf32> to vector<8x32xf32>
    %24 = arith.mulf %22, %23 : vector<8x32xf32>
    %25 = vector.broadcast %1 : vector<1x32xf32> to vector<8x32xf32>
    %26 = arith.addf %24, %25 : vector<8x32xf32>
    %27 = arith.truncf %26 : vector<8x32xf32> to vector<8x32xbf16>
    %c0_10 = arith.constant 0 : index
    %c0_11 = arith.constant 0 : index
    %28 = vector.load %arg9[%c0_10, %c0_11] : memref<8x64xbf16, #tpu.memory_space<vmem>>, vector<8x32xbf16>
    tpu.vector_store %arg9[%c0_10, %c0_11], %27 {strides = array<i32>} : memref<8x64xbf16, #tpu.memory_space<vmem>>, vector<8x32xbf16>,
    %c0_12 = arith.constant 0 : index
    %c32 = arith.constant 32 : index
    %29 = vector.load %arg1[%c0_12, %c32] : memref<8x64xf32, #tpu.memory_space<vmem>>, vector<8x32xf32>
    %cst_13 = arith.constant dense<0.000000e+00> : vector<8xf32>
    %30 = vector.multi_reduction <add>, %29, %cst_13 [1] : vector<8x32xf32> to vector<8xf32>
    %31 = vector.shape_cast %30 : vector<8xf32> to vector<8x1xf32>
    %cst_14 = arith.constant 3.200000e+01 : f32
    %32 = vector.broadcast %cst_14 : f32 to vector<8x1xf32>
    %33 = arith.divf %31, %32 : vector<8x1xf32>
    %34 = arith.mulf %29, %29 : vector<8x32xf32>
    %cst_15 = arith.constant dense<0.000000e+00> : vector<8xf32>
    %35 = vector.multi_reduction <add>, %34, %cst_15 [1] : vector<8x32xf32> to vector<8xf32>
    %36 = vector.shape_cast %35 : vector<8xf32> to vector<8x1xf32>
    %cst_16 = arith.constant 3.200000e+01 : f32
    %37 = vector.broadcast %cst_16 : f32 to vector<8x1xf32>
    %38 = arith.divf %36, %37 : vector<8x1xf32>
    %39 = arith.mulf %33, %33 : vector<8x1xf32>
    %40 = arith.subf %38, %39 : vector<8x1xf32>
    %cst_17 = arith.constant 0.000000e+00 : f32
    %41 = vector.broadcast %cst_17 : f32 to vector<8x1xf32>
    %42 = arith.maximumf %40, %41 : vector<8x1xf32>
    %43 = vector.broadcast %33 : vector<8x1xf32> to vector<8x32xf32>
    %44 = arith.subf %29, %43 : vector<8x32xf32>
    %cst_18 = arith.constant 9.99999974E-6 : f32
    %45 = vector.broadcast %cst_18 : f32 to vector<8x1xf32>
    %46 = arith.addf %42, %45 : vector<8x1xf32>
    %47 = math.rsqrt %46 : vector<8x1xf32>
    %48 = vector.broadcast %47 : vector<8x1xf32> to vector<8x32xf32>
    %49 = arith.mulf %44, %48 : vector<8x32xf32>
    %50 = vector.broadcast %0 : vector<1x32xf32> to vector<8x32xf32>
    %51 = arith.mulf %49, %50 : vector<8x32xf32>
    %52 = vector.broadcast %1 : vector<1x32xf32> to vector<8x32xf32>
    %53 = arith.addf %51, %52 : vector<8x32xf32>
    %54 = arith.truncf %53 : vector<8x32xf32> to vector<8x32xbf16>
    %c0_19 = arith.constant 0 : index
    %c32_20 = arith.constant 32 : index
    %55 = vector.load %arg9[%c0_19, %c32_20] : memref<8x64xbf16, #tpu.memory_space<vmem>>, vector<8x32xbf16>
    tpu.vector_store %arg9[%c0_19, %c32_20], %54 {strides = array<i32>} : memref<8x64xbf16, #tpu.memory_space<vmem>>, vector<8x32xbf16>,
    %c0_21 = arith.constant 0 : index
    %c0_22 = arith.constant 0 : index
    %56 = vector.load %arg4[%c0_21, %c0_22] : memref<64x8xbf16, #tpu.memory_space<vmem>>, vector<64x8xbf16>
    %c0_23 = arith.constant 0 : index
    %c0_24 = arith.constant 0 : index
    %57 = vector.load %arg9[%c0_23, %c0_24] : memref<8x64xbf16, #tpu.memory_space<vmem>>, vector<8x64xbf16>
    %cst_25 = arith.constant dense<0.000000e+00> : vector<64x64xf32>
    %58 = tpu.matmul %56, %57, %cst_25 {dimension_numbers = #tpu.dot_dimension_numbers<[1], [0], [0], [1], [0, 0, 1, 1], [], []>} : vector<64x8xbf16>, vector<8x64xbf16>, vector<64x64xf32> -> vector<64x64xf32>
    %c0_26 = arith.constant 0 : index
    %c0_27 = arith.constant 0 : index
    %59 = vector.load %arg5[%c0_26, %c0_27] : memref<64x1xf32, #tpu.memory_space<vmem>>, vector<64x1xf32>
    %60 = vector.broadcast %59 : vector<64x1xf32> to vector<64x64xf32>
    %61 = arith.addf %58, %60 : vector<64x64xf32>
    %cst_28 = arith.constant 5.000000e-01 : f32
    %62 = vector.broadcast %cst_28 : f32 to vector<64x64xf32>
    %63 = arith.mulf %62, %61 : vector<64x64xf32>
    %cst_29 = arith.constant 0.707106769 : f32
    %64 = vector.broadcast %cst_29 : f32 to vector<64x64xf32>
    %65 = arith.mulf %61, %64 : vector<64x64xf32>
    %66 = math.erf %65 : vector<64x64xf32>
    %cst_30 = arith.constant 1.000000e+00 : f32
    %67 = vector.broadcast %cst_30 : f32 to vector<64x64xf32>
    %68 = arith.addf %67, %66 : vector<64x64xf32>
    %69 = arith.mulf %63, %68 : vector<64x64xf32>
    %c0_31 = arith.constant 0 : index
    %c0_32 = arith.constant 0 : index
    %70 = vector.load %arg6[%c0_31, %c0_32] : memref<8x64xbf16, #tpu.memory_space<vmem>>, vector<8x64xbf16>
    %71 = arith.truncf %69 : vector<64x64xf32> to vector<64x64xbf16>
    %cst_33 = arith.constant dense<0.000000e+00> : vector<8x64xf32>
    %72 = tpu.matmul %70, %71, %cst_33 {dimension_numbers = #tpu.dot_dimension_numbers<[1], [0], [0], [1], [0, 0, 1, 1], [], []>} : vector<8x64xbf16>, vector<64x64xbf16>, vector<8x64xf32> -> vector<8x64xf32>
    %c0_34 = arith.constant 0 : index
    %c0_35 = arith.constant 0 : index
    %73 = vector.load %arg7[%c0_34, %c0_35] : memref<8x1xf32, #tpu.memory_space<vmem>>, vector<8x1xf32>
    %74 = vector.broadcast %73 : vector<8x1xf32> to vector<8x64xf32>
    %75 = arith.addf %72, %74 : vector<8x64xf32>
    %c0_36 = arith.constant 0 : index
    %c0_37 = arith.constant 0 : index
    %76 = vector.load %arg1[%c0_36, %c0_37] : memref<8x64xf32, #tpu.memory_space<vmem>>, vector<8x64xf32>
    %77 = arith.addf %76, %75 : vector<8x64xf32>
    %c0_38 = arith.constant 0 : index
    %c0_39 = arith.constant 0 : index
    %78 = vector.load %arg8[%c0_38, %c0_39] : memref<8x64xf32, #tpu.memory_space<vmem>>, vector<8x64xf32>
    tpu.vector_store %arg8[%c0_38, %c0_39], %77 {strides = array<i32>} : memref<8x64xf32, #tpu.memory_space<vmem>>, vector<8x64xf32>,
    return
  }
  func.func @transform_0(%arg0: i32) -> (i32, i32) {
    %c0_i32 = arith.constant 0 : i32
    %c0_i32_0 = arith.constant 0 : i32
    return %c0_i32, %arg0 : i32, i32
  }
  func.func @transform_1(%arg0: i32) -> (i32, i32) {
    %c0_i32 = arith.constant 0 : i32
    %c0_i32_0 = arith.constant 0 : i32
    %c0_i32_1 = arith.constant 0 : i32
    return %c0_i32, %c0_i32_0 : i32, i32
  }
  func.func @transform_2(%arg0: i32) -> (i32, i32) {
    %c0_i32 = arith.constant 0 : i32
    %c0_i32_0 = arith.constant 0 : i32
    %c0_i32_1 = arith.constant 0 : i32
    return %c0_i32, %c0_i32_0 : i32, i32
  }
  func.func @transform_3(%arg0: i32) -> (i32, i32) {
    %c0_i32 = arith.constant 0 : i32
    %c0_i32_0 = arith.constant 0 : i32
    %c0_i32_1 = arith.constant 0 : i32
    return %c0_i32, %c0_i32_0 : i32, i32
  }
  func.func @transform_4(%arg0: i32) -> (i32, i32) {
    %c0_i32 = arith.constant 0 : i32
    %c0_i32_0 = arith.constant 0 : i32
    %c0_i32_1 = arith.constant 0 : i32
    return %c0_i32, %c0_i32_0 : i32, i32
  }
  func.func @transform_5(%arg0: i32) -> (i32, i32) {
    %c0_i32 = arith.constant 0 : i32
    %c0_i32_0 = arith.constant 0 : i32
    %c0_i32_1 = arith.constant 0 : i32
    return %c0_i32, %c0_i32_0 : i32, i32
  }
  func.func @transform_6(%arg0: i32) -> (i32, i32) {
    %c0_i32 = arith.constant 0 : i32
    %c0_i32_0 = arith.constant 0 : i32
    %c0_i32_1 = arith.constant 0 : i32
    return %c0_i32, %c0_i32_0 : i32, i32
  }
  func.func @transform_7(%arg0: i32) -> (i32, i32) {
    %c0_i32 = arith.constant 0 : i32
    %c0_i32_0 = arith.constant 0 : i32
    return %c0_i32, %arg0 : i32, i32
  }
}

</mosaic_0001>

<bundles_post_ra>
// kernel: tpu_custom_call.1
= control target key start
LH: loop header
LB: loop body
LE: loop exit
PB: predicated region body
PF: predicated region fallthrough
CT: control target
= control target key end

     0   :  { %vm31_vm0 = vcmask 261120   ;;  %s736_s26 = smov 96   ;;  %s1150_s0 = inlined_call_operand.vmem [shape: f32[8,64], index: 0, kind: input, shape index: {}]   ;;  %s1151_s1 = inlined_call_operand.vmem [shape: f32[1,32], index: 1, kind: input, shape index: {}]   ;;  %s1152_s2 = inlined_call_operand.vmem [shape: f32[1,32], index: 2, kind: input, shape index: {}]   ;;  %s1153_s3 = inlined_call_operand.vmem [shape: bf16[64,8], index: 3, kind: input, shape index: {}]   ;;  %s1154_s4 = inlined_call_operand.vmem [shape: f32[64,1], index: 4, kind: input, shape index: {}]   ;;  %s1155_s5 = inlined_call_operand.vmem [shape: bf16[8,64], index: 5, kind: input, shape index: {}]   ;;  %s1156_s6 = inlined_call_operand.vmem [shape: f32[8,1], index: 6, kind: input, shape index: {}]   ;;  %s1157_s7 = inlined_call_operand.hbm [shape: f32[8,64], index: 7, kind: output, shape index: {}]  }
   0x1   :  { %v784_v0 = vld [vmem:[%s1150_s0] sm:$0xff] }
   0x2   :  { %77 = vrot.lane.b32.xlu0 %v784_v0, %s736_s26  ;;  %v84_v1 = vmul.f32 %v784_v0, %v784_v0  ;;  %v32_v2 = vsel %vm31_vm0, %v784_v0, 0.0 }
   0x3   :  { %12 = vsyncpa [#allocation4], 0  ;;  %33 = vadd.xlane.f32.xlu1 %v32_v2  ;;  %v685_v4 = vld [vmem:[%s1151_s1] ss:$0 sm:$0xff]  ;;  %s737_s29 = smov 32   ;;  %v738_v7 = vmov 32.0  }
   0x4   :  { %v44_v3 = vsel %vm31_vm0, %v84_v1, 0.0  ;;  %687 = vrcp.f32 %v738_v7  ;;  %v686_v13 = vld [vmem:[%s1152_s2] ss:$0 sm:$0xff]  ;;  %vm73_vm5 = vcmask 257024   ;;  %v136_v47 = vld [vmem:[%s1154_s4 + $0x38] sm:$0xff]  ;;  %v131_v48 = vld [vmem:[%s1154_s4 + $0x10] sm:$0xff] }
   0x5   :  { %45 = vadd.xlane.f32.xlu2 %v44_v3  ;;  %v739_v49 = vmov 0   ;;  %v133_v53 = vld [vmem:[%s1154_s4 + $0x20] sm:$0xff]  ;;  %v135_v62 = vld [vmem:[%s1154_s4 + $0x30] sm:$0xff]  ;;  %v130_v63 = vld [vmem:[%s1154_s4 + $0x8] sm:$0xff]  ;;  %vm118_vm9 = vcmask 519424   ;;  %vm210_vm10 = vcmask 1043456  }
   0x6   :  { %683 = vset.pattern.permute.xlu0 %v739_v49  ;;  %684 = vset.pattern.permute.xlu1 %v739_v49  ;;  %v134_v2 = vld [vmem:[%s1154_s4 + $0x28] sm:$0xff]  ;;  %v600_v3 = vld [vmem:[%s1156_s6] sm:$0xff]  ;;  %vm197_vm11 = vcmask 64512   ;;  %s740_s1 = smov [#allocation3]   ;;  %s633_s11 = sshll.u32 %s1157_s7, 4  ;;  %s634_s11 = int_to_ptr.hbm [resolvable:$true] %s633_s11 }
   0x7   :  { %682 = vset.pattern.permute.xlu2 %v739_v49  ;;  %v672_v7 = vld [vmem:[%s1153_s3 + $0x8] sm:$0xff]  ;;  %s631_s2 = sshll.u32 %s740_s1, 4  ;;  %s632_s2 = int_to_ptr.vmem [resolvable:$true] %s631_s2 }
   0xa   :  { %86 = vrot.lane.b32.xlu0 %v84_v1, %s736_s26  ;;  %v688_v10 = vpop.eup %687 }
   0xb   :  { %v36_v11 = vmul.f32 32.0, %v688_v10  ;;  %vm40_vm1 = vweird.f32 %v688_v10 }
   0xd   :  { %v37_v12 = vsub.f32 1.0, %v36_v11 }
   0xf   :  { %v38_v14 = vmul.f32 %v688_v10, %v37_v12 }
  0x11   :  { %v39_v15 = vadd.f32 %v688_v10, %v38_v14 }
  0x12   :  { %109 = vrot.lane.b32.xlu0 %v685_v4, %s737_s29 }
  0x13   :  { %v41_v16 = vsel %vm40_vm1, %v688_v10, %v39_v15  ;;  %v673_v10 = vld [vmem:[%s1153_s3 + $0x10] sm:$0xff] }
  0x1a   :  { %174 = vperm.xlu0 %683, %v136_v47  }
  0x22   :  { %159 = vperm.xlu0 %683, %v133_v53  }
  0x74   :  { %v78_v5 = vpop.permute.xlu0 %77 }
  0x75   :  { %v80_v6 = vsel %vm31_vm0, %v78_v5, 0.0 }
  0x76   :  { %81 = vadd.xlane.f32.xlu1 %v80_v6  ;;  %v34_v17 = vpop.xlane.xlu1 %33  ;;  %v671_v6 = vld [vmem:[%s1153_s3] sm:$0xff] }
  0x77   :  { %v42_v18 = vmul.f32 %v41_v16, %v34_v17 }
  0x78   :  { %v46_v19 = vpop.xlane.xlu2 %45 }
  0x79   :  { %v48_v20 = vmul.f32 %v42_v18, %v42_v18  ;;  %v47_v21 = vmul.f32 %v46_v19, %v41_v16  ;;  %v51_v31 = vsub.f32 %v784_v0, %v42_v18 }
  0x7b   :  { %v49_v22 = vsub.f32 %v47_v21, %v48_v20 }
  0x7c   :  { %v87_v8 = vpop.permute.xlu0 %86 }
  0x7d   :  { %v89_v9 = vsel %vm31_vm0, %v87_v8, 0.0  ;;  %v50_v23 = vmax.f32 %v49_v22, 0.0  ;;  %v674_v8 = vld [vmem:[%s1153_s3 + $0x18] sm:$0xff] }
  0x7e   :  { %90 = vadd.xlane.f32.xlu2 %v89_v9  ;;  %v129_v9 = vld [vmem:[%s1154_s4] sm:$0xff] }
  0x7f   :  { %v52_v24 = vadd.f32 1e-05, %v50_v23 }
  0x81   :  { %689 = vrsqrt.f32 %v52_v24  ;;  %vm59_vm2 = vweird.f32 %v52_v24 }
  0x84   :  { %v110_v57 = vpop.permute.xlu0 %109 }
  0x87   :  { %v690_v25 = vpop.eup %689 }
  0x88   :  { %v54_v26 = vmul.f32 %v690_v25, %v52_v24  ;;  %vm60_vm3 = vweird.f32 %v690_v25 }
  0x89   :  { %vm61_vm4 = vmor %vm59_vm2, %vm60_vm3 }
  0x8a   :  { %v55_v27 = vmul.f32 %v690_v25, %v54_v26 }
  0x8c   :  { %v56_v28 = vmul.f32 0.5, %v55_v27  ;;  %v175_v12 = vpop.permute.xlu0 %174 }
  0x8e   :  { %v57_v29 = vsub.f32 1.5, %v56_v28 }
  0x8f   :  { %113 = vrot.lane.b32.xlu1 %v686_v13, %s737_s29 }
  0x90   :  { %v58_v30 = vmul.f32 %v690_v25, %v57_v29 }
  0x92   :  { %v62_v32 = vsel %vm61_vm4, %v690_v25, %v58_v30 }
  0x93   :  { %v63_v33 = vmul.f32 %v62_v32, %v51_v31 }
  0x94   :  { %v160_v14 = vpop.permute.xlu0 %159 }
  0x95   :  { %v67_v34 = vmul.f32 %v685_v4, %v63_v33 }
  0x96   :  { %169 = vperm.xlu2 %682, %v135_v62  }
  0x97   :  { %v71_v35 = vadd.f32 %v686_v13, %v67_v34  ;;  %149 = vperm.xlu1 %684, %v131_v48  }
  0x99   :  { %v72_v36 = vpack.c.bf16 %v71_v35, %v71_v35 }
  0x9b   :  { %74 = vst.msk [vmem:[#allocation2] sm:$0xf] %vm73_vm5, %v72_v36 }
  0x9e   :  { %164 = vperm.xlu2 %682, %v134_v2  }
  0x9f   :  { %144 = vperm.xlu1 %684, %v130_v63  }
  0xa6   :  { %139 = vperm.xlu2 %682, %v129_v9  }
  0xe9   :  { %v82_v37 = vpop.xlane.xlu1 %81 }
  0xea   :  { %v83_v38 = vmul.f32 %v82_v37, %v41_v16 }
  0xec   :  { %v93_v40 = vmul.f32 %v83_v38, %v83_v38  ;;  %v96_v55 = vsub.f32 %v784_v0, %v83_v38  ;;  %v132_v0 = vld [vmem:[%s1154_s4 + $0x18] sm:$0xff] }
  0xed   :  { %154 = vperm.xlu0 %683, %v132_v0  }
  0xf1   :  { %v91_v39 = vpop.xlane.xlu2 %90 }
  0xf2   :  { %v92_v41 = vmul.f32 %v91_v39, %v41_v16 }
  0xf4   :  { %v94_v42 = vsub.f32 %v92_v41, %v93_v40 }
  0xf5   :  { %603 = vperm.xlu0 %683, %v600_v3  }
  0xf6   :  { %v95_v43 = vmax.f32 %v94_v42, 0.0 }
  0xf8   :  { %v97_v44 = vadd.f32 1e-05, %v95_v43 }
  0xf9   :  { %v170_v11 = vpop.permute.xlu2 %169 }
  0xfa   :  { %691 = vrsqrt.f32 %v97_v44  ;;  %vm104_vm7 = vweird.f32 %v97_v44 }
 0x100   :  { %v692_v45 = vpop.eup %691 }
 0x101   :  { %v99_v46 = vmul.f32 %v692_v45, %v97_v44  ;;  %vm105_vm6 = vweird.f32 %v692_v45  ;;  %v114_v59 = vpop.permute.xlu1 %113  ;;  %v841_v13 = vpop.permute.xlu2 %164 }
 0x102   :  { %vm106_vm8 = vmor %vm104_vm7, %vm105_vm6 }
 0x103   :  { %v100_v50 = vmul.f32 %v692_v45, %v99_v46 }
 0x105   :  { %v101_v51 = vmul.f32 0.5, %v100_v50 }
 0x107   :  { %v102_v52 = vsub.f32 1.5, %v101_v51 }
 0x109   :  { %v103_v54 = vmul.f32 %v692_v45, %v102_v52  ;;  %v140_v15 = vpop.permute.xlu2 %139  ;;  %v150_v16 = vpop.permute.xlu1 %149 }
 0x10b   :  { %v107_v56 = vsel %vm106_vm8, %v692_v45, %v103_v54 }
 0x10c   :  { %v108_v58 = vmul.f32 %v107_v56, %v96_v55 }
 0x10e   :  { %v112_v60 = vmul.f32 %v110_v57, %v108_v58 }
 0x110   :  { %v116_v61 = vadd.f32 %v114_v59, %v112_v60 }
 0x111   :  { %v145_v36 = vpop.permute.xlu1 %144 }
 0x112   :  { %v117_v1 = vpack.c.bf16 %v116_v61, %v116_v61 }
 0x114   :  { %119 = vst.msk [vmem:[#allocation2] sm:$0xf] %vm118_vm9, %v117_v1 }
 0x11b   :  { %v128_v4 = vld [vmem:[#allocation2] sm:$0xf] }
 0x11c   :  { %v212_v5 = vsel %vm210_vm10, %v128_v4, 0 }
 0x11d   :  { %221 = vmatpush.bf16.msra.mxu0 %v212_v5  ;;  %675 = vmatpush.bf16.msra.mxu2 %v212_v5 }
 0x11e   :  { %676 = vmatpush.bf16.msra.mxu3 %v212_v5 }
 0x120   :  { %658 = vmatmul.msk.bf16.vlgmr.msra.gmra.mxu0 %vm197_vm11, %v671_v6  ;;  %659 = vmatmul.msk.bf16.vlgmr.msra.gmra.mxu2 %vm197_vm11, %v672_v7 }
 0x121   :  { %661 = vmatmul.msk.bf16.vlgmr.msra.gmra.mxu3 %vm197_vm11, %v674_v8 }
 0x130   :  { %660 = vmatmul.msk.bf16.gmra.mxu2 %vm197_vm11, %v673_v10 }
 0x15f   :  { %v155_v30 = vpop.permute.xlu0 %154 }
 0x19d   :  { %v223_v17 = vpop.f32.mrf.mxu0 }
 0x19e   :  { %v847_v22 = vadd.f32 %v223_v17, %v140_v15 }
 0x1a0   :  { %v860_v27 = vmul.f32 0.70710677, %v847_v22 }
 0x1a2   :  { %v259_v40 = vmul.f32 %v860_v27, %v860_v27 }
 0x1a3   :  { %v228_v18 = vpop.f32.mrf.mxu2 }
 0x1a4   :  { %v843_v19 = vadd.f32 %v228_v18, %v150_v16  ;;  %v238_v20 = vpop.f32.mrf.mxu3  ;;  %v886_v49 = vmin.f32 %v259_v40, 16.0 }
 0x1a5   :  { %v845_v21 = vadd.f32 %v238_v20, %v170_v11  ;;  %v225_v37 = vpop.f32.mrf.mxu0 }
 0x1a6   :  { %v850_v23 = vmul.f32 0.70710677, %v843_v19  ;;  %v878_v44 = vadd.f32 %v225_v37, %v145_v36  ;;  %v261_v62 = vmul.f32 2.1237322e-06, %v886_v49  ;;  %v272_v17 = vmul.f32 3.8918573e-05, %v886_v49 }
 0x1a7   :  { %v853_v24 = vmul.f32 0.70710677, %v845_v21 }
 0x1a8   :  { %v339_v25 = vmul.f32 %v850_v23, %v850_v23  ;;  %v895_v56 = vmul.f32 0.70710677, %v878_v44  ;;  %v262_v9 = vadd.f32 0.00028619796, %v261_v62 }
 0x1a9   :  { %v499_v26 = vmul.f32 %v853_v24, %v853_v24 }
 0x1aa   :  { %v862_v28 = vmin.f32 %v339_v25, 16.0  ;;  %v299_v4 = vmul.f32 %v895_v56, %v895_v56  ;;  %v263_v36 = vmul.f32 %v262_v9, %v886_v49 }
 0x1ab   :  { %v864_v29 = vmin.f32 %v499_v26, 16.0  ;;  %v230_v31 = vpop.f32.mrf.mxu2 }
 0x1ac   :  { %v341_v32 = vmul.f32 2.1237322e-06, %v862_v28  ;;  %v867_v33 = vadd.f32 %v230_v31, %v155_v30  ;;  %v240_v34 = vpop.f32.mrf.mxu3  ;;  %v919_v20 = vmin.f32 %v299_v4, 16.0 }
 0x1ad   :  { %v501_v35 = vmul.f32 2.1237322e-06, %v864_v29  ;;  %v870_v38 = vadd.f32 %v240_v34, %v175_v12  ;;  %v512_v39 = vmul.f32 3.8918573e-05, %v864_v29 }
 0x1ae   :  { %v342_v41 = vadd.f32 0.00028619796, %v341_v32  ;;  %v876_v43 = vmul.f32 0.70710677, %v867_v33  ;;  %v352_v32 = vmul.f32 3.8918573e-05, %v862_v28 }
 0x1af   :  { %v502_v42 = vadd.f32 0.00028619796, %v501_v35  ;;  %v881_v45 = vmul.f32 0.70710677, %v870_v38  ;;  %v513_v48 = vadd.f32 0.001143296, %v512_v39 }
 0x1b0   :  { %v379_v47 = vmul.f32 %v876_v43, %v876_v43  ;;  %v343_v50 = vmul.f32 %v342_v41, %v862_v28 }
 0x1b1   :  { %v503_v46 = vmul.f32 %v502_v42, %v864_v29  ;;  %v539_v51 = vmul.f32 %v881_v45, %v881_v45  ;;  %v514_v55 = vmul.f32 %v513_v48, %v864_v29 }
 0x1b2   :  { %v891_v53 = vmin.f32 %v379_v47, 16.0  ;;  %v344_v63 = vadd.f32 0.0036580483, %v343_v50  ;;  %v353_v50 = vadd.f32 0.001143296, %v352_v32 }
 0x1b3   :  { %v504_v52 = vadd.f32 0.0036580483, %v503_v46  ;;  %v233_v54 = vpop.f32.mrf.mxu2  ;;  %v897_v57 = vmin.f32 %v539_v51, 16.0  ;;  %v515_v61 = vadd.f32 0.014752088, %v514_v55 }
 0x1b4   :  { %v381_v59 = vmul.f32 2.1237322e-06, %v891_v53  ;;  %v901_v60 = vadd.f32 %v233_v54, %v160_v14  ;;  %v345_v10 = vmul.f32 %v344_v63, %v862_v28  ;;  %v273_v46 = vadd.f32 0.001143296, %v272_v17 }
 0x1b5   :  { %v505_v58 = vmul.f32 %v504_v52, %v864_v29  ;;  %v541_v0 = vmul.f32 2.1237322e-06, %v897_v57  ;;  %v516_v3 = vmul.f32 %v515_v61, %v864_v29  ;;  %v552_v55 = vmul.f32 3.8918573e-05, %v897_v57 }
 0x1b6   :  { %v382_v2 = vadd.f32 0.00028619796, %v381_v59  ;;  %v910_v7 = vmul.f32 0.70710677, %v901_v60  ;;  %v346_v34 = vadd.f32 0.05243302, %v345_v10  ;;  %v956_v4 = vmul.f32 %v273_v46, %v886_v49 }
 0x1b7   :  { %v506_v1 = vadd.f32 0.05243302, %v505_v58  ;;  %v542_v5 = vadd.f32 0.00028619796, %v541_v0  ;;  %v517_v8 = vadd.f32 0.112945676, %v516_v3 }
 0x1b8   :  { %v383_v12 = vmul.f32 %v382_v2, %v891_v53  ;;  %v419_v14 = vmul.f32 %v910_v7, %v910_v7  ;;  %v347_v51 = vmul.f32 %v346_v34, %v862_v28  ;;  %v942_v58 = vadd.f32 0.0036580483, %v263_v36 }
 0x1b9   :  { %v507_v6 = vmul.f32 %v506_v1, %v864_v29  ;;  %v543_v11 = vmul.f32 %v542_v5, %v897_v57  ;;  %v518_v16 = vmul.f32 %v517_v8, %v864_v29  ;;  %v948_v61 = vmul.f32 0.5, %v845_v21 }
 0x1ba   :  { %v924_v30 = vmin.f32 %v419_v14, 16.0  ;;  %v384_v37 = vadd.f32 0.0036580483, %v383_v12  ;;  %v553_v2 = vadd.f32 0.001143296, %v552_v55  ;;  %v354_v21 = vmul.f32 %v353_v50, %v862_v28 }
 0x1bb   :  { %v235_v15 = vpop.f32.mrf.mxu2  ;;  %v508_v18 = vadd.f32 0.18741608, %v507_v6  ;;  %v544_v25 = vadd.f32 0.0036580483, %v543_v11  ;;  %v519_v31 = vadd.f32 0.4994258, %v518_v16 }
 0x1bc   :  { %v922_v26 = vadd.f32 %v235_v15, %v841_v13  ;;  %v421_v39 = vmul.f32 2.1237322e-06, %v924_v30  ;;  %v301_v13 = vmul.f32 2.1237322e-06, %v919_v20  ;;  %v432_v3 = vmul.f32 3.8918573e-05, %v924_v30 }
 0x1bd   :  { %v545_v35 = vmul.f32 %v544_v25, %v897_v57  ;;  %v520_v40 = vmul.f32 %v519_v31, %v864_v29  ;;  %v509_v41 = vmul.f32 %v508_v18, %v864_v29  ;;  %v385_v29 = vmul.f32 %v384_v37, %v891_v53 }
 0x1be   :  { %v934_v42 = vmul.f32 0.70710677, %v922_v26  ;;  %v422_v47 = vadd.f32 0.00028619796, %v421_v39  ;;  %v950_v63 = vadd.f32 0.00028619796, %v301_v13  ;;  %v554_v11 = vmul.f32 %v553_v2, %v897_v57 }
 0x1bf   :  { %v936_v48 = vadd.f32 1.0, %v520_v40  ;;  %v546_v52 = vadd.f32 0.05243302, %v545_v35  ;;  %v510_v62 = vadd.f32 1.1283791, %v509_v41 }
 0x1c0   :  { %v459_v54 = vmul.f32 %v934_v42, %v934_v42  ;;  %v423_v59 = vmul.f32 %v422_v47, %v924_v30  ;;  %v958_v5 = vadd.f32 0.18741608, %v347_v51  ;;  %v963_v9 = vadd.f32 0.05243302, %v385_v29 }
 0x1c1   :  { %693 = vrcp.f32 %v936_v48  ;;  %v547_v6 = vmul.f32 %v546_v52, %v897_v57  ;;  %v433_v12 = vadd.f32 0.001143296, %v432_v3  ;;  %v511_v14 = vmul.f32 %v510_v62, %v853_v24 }
 0x1c2   :  { %v952_v0 = vmin.f32 %v459_v54, 16.0  ;;  %v424_v1 = vadd.f32 0.0036580483, %v423_v59  ;;  %v531_v16 = vand.u32 2147483647, %v936_v48  ;;  %vm527_vm12 = vweird.f32 %v936_v48 }
 0x1c3   :  { %v555_v31 = vadd.f32 0.014752088, %v554_v11  ;;  %v434_v32 = vmul.f32 %v433_v12, %v924_v30  ;;  %v548_v34 = vadd.f32 0.18741608, %v547_v6  ;;  %v533_v37 = vand.u32 2147483648, %v936_v48 }
 0x1c4   :  { %v461_v8 = vmul.f32 2.1237322e-06, %v952_v0  ;;  %v425_v10 = vmul.f32 %v424_v1, %v924_v30  ;;  %v472_v17 = vmul.f32 3.8918573e-05, %v952_v0  ;;  %vm977_vm13 = vcmp.eq.f32.partialorder %v531_v16, 8.507059e+37 }
 0x1c5   :  { %v556_v39 = vmul.f32 %v555_v31, %v897_v57  ;;  %v435_v40 = vadd.f32 0.014752088, %v434_v32  ;;  %v355_v50 = vadd.f32 0.014752088, %v354_v21  ;;  %v392_v62 = vmul.f32 3.8918573e-05, %v891_v53 }
 0x1c6   :  { %v462_v15 = vadd.f32 0.00028619796, %v461_v8  ;;  %v426_v25 = vadd.f32 0.05243302, %v425_v10  ;;  %v473_v41 = vadd.f32 0.001143296, %v472_v17  ;;  %v303_v47 = vmul.f32 %v950_v63, %v919_v20 }
 0x1c7   :  { %v694_v18 = vpop.eup %693  ;;  %v557_v51 = vadd.f32 0.112945676, %v556_v39  ;;  %v436_v52 = vmul.f32 %v435_v40, %v924_v30  ;;  %v356_v59 = vmul.f32 %v355_v50, %v862_v28  ;;  %v393_v11 = vadd.f32 0.001143296, %v392_v62 }
 0x1c8   :  { %v463_v35 = vmul.f32 %v462_v15, %v952_v0  ;;  %v523_v36 = vmul.f32 %v694_v18, %v936_v48  ;;  %v427_v24 = vmul.f32 %v426_v25, %v924_v30  ;;  %vm528_vm14 = vweird.f32 %v694_v18 }
 0x1c9   :  { %v474_v54 = vmul.f32 %v473_v41, %v952_v0  ;;  %v558_v2 = vmul.f32 %v557_v51, %v897_v57  ;;  %v437_v3 = vadd.f32 0.112945676, %v436_v52  ;;  %v357_v10 = vadd.f32 0.112945676, %v356_v59  ;;  %vm529_vm15 = vmor %vm527_vm12, %vm528_vm14 }
 0x1ca   :  { %v464_v13 = vadd.f32 0.0036580483, %v463_v35  ;;  %v524_v46 = vsub.f32 1.0, %v523_v36  ;;  %v428_v1 = vadd.f32 0.18741608, %v427_v24  ;;  %v534_v12 = vor.u32 1.1754944e-38, %v533_v37 }
 0x1cb   :  { %v475_v6 = vadd.f32 0.014752088, %v474_v54  ;;  %v559_v15 = vadd.f32 0.4994258, %v558_v2  ;;  %v438_v16 = vmul.f32 %v437_v3, %v924_v30  ;;  %v358_v32 = vmul.f32 %v357_v10, %v862_v28 }
 0x1cc   :  { %v465_v55 = vmul.f32 %v464_v13, %v952_v0  ;;  %v525_v29 = vmul.f32 %v694_v18, %v524_v46  ;;  %v394_v35 = vmul.f32 %v393_v11, %v891_v53  ;;  %v549_v36 = vmul.f32 %v548_v34, %v897_v57 }
 0x1cd   :  { %v476_v17 = vmul.f32 %v475_v6, %v952_v0  ;;  %v560_v48 = vmul.f32 %v559_v15, %v897_v57  ;;  %v439_v37 = vadd.f32 0.4994258, %v438_v16  ;;  %v429_v39 = vmul.f32 %v428_v1, %v924_v30 }
 0x1ce   :  { %v466_v8 = vadd.f32 0.05243302, %v465_v55  ;;  %v526_v21 = vadd.f32 %v694_v18, %v525_v29  ;;  %v359_v13 = vadd.f32 0.4994258, %v358_v32  ;;  %v395_v51 = vadd.f32 0.014752088, %v394_v35 }
 0x1cf   :  { %v477_v41 = vadd.f32 0.112945676, %v476_v17  ;;  %v1000_v50 = vadd.f32 1.0, %v560_v48  ;;  %v1005_v34 = vmul.f32 %v942_v58, %v886_v49  ;;  %v349_v54 = vmul.f32 %v958_v5, %v862_v28 }
 0x1d0   :  { %v467_v25 = vmul.f32 %v466_v8, %v952_v0  ;;  %v530_v31 = vsel %vm529_vm15, %v694_v18, %v526_v21  ;;  %v440_v18 = vmul.f32 %v439_v37, %v924_v30  ;;  %v360_v52 = vmul.f32 %v359_v13, %v862_v28 }
 0x1d1   :  { %v535_v24 = vsel %vm977_vm13, %v534_v12, %v530_v31  ;;  %v478_v57 = vmul.f32 %v477_v41, %v952_v0  ;;  %695 = vrcp.f32 %v1000_v50  ;;  %v387_v30 = vmul.f32 %v963_v9, %v891_v53 }
 0x1d2   :  { %v468_v40 = vadd.f32 0.18741608, %v467_v25  ;;  %v536_v46 = vmul.f32 %v535_v24, %v511_v14  ;;  %v550_v14 = vadd.f32 1.1283791, %v549_v36  ;;  %v430_v58 = vadd.f32 1.1283791, %v429_v39 }
 0x1d3   :  { %v1017_v29 = vadd.f32 1.0, %v440_v18  ;;  %v479_v59 = vadd.f32 0.4994258, %v478_v57  ;;  %v1019_v62 = vadd.f32 1.0, %v360_v52  ;;  %v396_v1 = vmul.f32 %v395_v51, %v891_v53 }
 0x1d4   :  { %v469_v55 = vmul.f32 %v468_v40, %v952_v0  ;;  %v668_v63 = vclamps-f32 %v536_v46, 1.0  ;;  %v275_v2 = vadd.f32 0.014752088, %v956_v4  ;;  %v1024_v28 = vmul.f32 0.5, %v870_v38 }
 0x1d5   :  { %v571_v5 = vand.u32 2147483647, %v1000_v50  ;;  %v573_v3 = vand.u32 2147483648, %v1000_v50  ;;  %697 = vrcp.f32 %v1017_v29  ;;  %v1029_v9 = vadd.f32 0.0036580483, %v303_v47 }
 0x1d6   :  { %v470_v6 = vadd.f32 1.1283791, %v469_v55  ;;  %v480_v8 = vmul.f32 %v479_v59, %v952_v0  ;;  %699 = vrcp.f32 %v1019_v62  ;;  %v1033_v21 = vadd.f32 1.1283791, %v349_v54 }
 0x1d7   :  { %v1035_v10 = vadd.f32 0.18741608, %v387_v30  ;;  %v551_v38 = vmul.f32 %v550_v14, %v881_v45  ;;  %v397_v4 = vadd.f32 0.112945676, %v396_v1  ;;  %v696_v11 = vpop.eup %695  ;;  %v431_v12 = vmul.f32 %v430_v58, %v910_v7 }
 0x1d8   :  { %v585_v15 = vadd.f32 1.0, %v668_v63  ;;  %v1039_v16 = vadd.f32 1.0, %v480_v8  ;;  %v276_v17 = vmul.f32 %v275_v2, %v886_v49  ;;  %v563_v25 = vmul.f32 %v696_v11, %v1000_v50 }
 0x1d9   :  { %vm567_vm0 = vweird.f32 %v1000_v50  ;;  %vm1044_vm1 = vcmp.eq.f32.partialorder %v571_v5, 8.507059e+37  ;;  %v574_v31 = vor.u32 1.1754944e-38, %v573_v3  ;;  %v1049_v45 = vmul.f32 %v470_v6, %v934_v42 }
 0x1da   :  { %v451_v32 = vand.u32 2147483647, %v1017_v29  ;;  %v453_v7 = vand.u32 2147483648, %v1017_v29  ;;  %701 = vrcp.f32 %v1039_v16  ;;  %v564_v36 = vsub.f32 1.0, %v563_v25 }
 0x1db   :  { %v698_v35 = vpop.eup %697  ;;  %v398_v24 = vmul.f32 %v397_v4, %v891_v53  ;;  %v277_v48 = vadd.f32 0.112945676, %v276_v17  ;;  %v312_v37 = vmul.f32 3.8918573e-05, %v919_v20  ;;  %v1059_v40 = vmul.f32 %v585_v15, %v948_v61 }
 0x1dc   :  { %v1056_v39 = vpop.eup %699  ;;  %v443_v42 = vmul.f32 %v698_v35, %v1017_v29  ;;  %vm447_vm2 = vweird.f32 %v1017_v29  ;;  %v373_v41 = vand.u32 2147483648, %v1019_v62  ;;  %v565_v13 = vmul.f32 %v696_v11, %v564_v36 }
 0x1dd   :  { %vm568_vm3 = vweird.f32 %v696_v11  ;;  %v363_v46 = vmul.f32 %v1056_v39, %v1019_v62  ;;  %v399_v18 = vadd.f32 0.4994258, %v398_v24  ;;  %vm1066_vm4 = vcmp.eq.f32.partialorder %v451_v32, 8.507059e+37 }
 0x1de   :  { %v444_v51 = vsub.f32 1.0, %v443_v42  ;;  %v278_v61 = vmul.f32 %v277_v48, %v886_v49  ;;  %v313_v57 = vadd.f32 0.001143296, %v312_v37  ;;  %v566_v52 = vadd.f32 %v696_v11, %v565_v13  ;;  %vm569_vm5 = vmor %vm567_vm0, %vm568_vm3 }
 0x1df   :  { %v454_v54 = vor.u32 1.1754944e-38, %v453_v7  ;;  %v364_v14 = vsub.f32 1.0, %v363_v46  ;;  %v400_v55 = vmul.f32 %v399_v18, %v891_v53  ;;  %vm448_vm6 = vweird.f32 %v698_v35 }
 0x1e0   :  { %v702_v30 = vpop.eup %701  ;;  %v445_v58 = vmul.f32 %v698_v35, %v444_v51  ;;  %v491_v59 = vand.u32 2147483647, %v1039_v16  ;;  %v279_v63 = vadd.f32 0.4994258, %v278_v61  ;;  %v570_v1 = vsel %vm569_vm5, %v696_v11, %v566_v52  ;;  %vm449_vm7 = vmor %vm447_vm2, %vm448_vm6 }
 0x1e1   :  { %v483_v2 = vmul.f32 %v702_v30, %v1039_v16  ;;  %v365_v5 = vmul.f32 %v1056_v39, %v364_v14  ;;  %v314_v3 = vmul.f32 %v313_v57, %v919_v20  ;;  %v575_v6 = vsel %vm1044_vm1, %v574_v31, %v570_v1 }
 0x1e2   :  { %v446_v8 = vadd.f32 %v698_v35, %v445_v58  ;;  %v493_v4 = vand.u32 2147483648, %v1039_v16  ;;  %v1081_v50 = vadd.f32 1.0, %v400_v55  ;;  %v576_v15 = vmul.f32 %v575_v6, %v551_v38 }
 0x1e3   :  { %v484_v17 = vsub.f32 1.0, %v483_v2  ;;  %vm368_vm8 = vweird.f32 %v1056_v39  ;;  %v280_v11 = vmul.f32 %v279_v63, %v886_v49  ;;  %vm488_vm9 = vweird.f32 %v702_v30 }
 0x1e4   :  { %v450_v25 = vsel %vm449_vm7, %v698_v35, %v446_v8  ;;  %v366_v32 = vadd.f32 %v1056_v39, %v365_v5  ;;  %703 = vrcp.f32 %v1081_v50  ;;  %v669_v0 = vclamps-f32 %v576_v15, 1.0 }
 0x1e5   :  { %v455_v31 = vsel %vm1066_vm4, %v454_v54, %v450_v25  ;;  %v485_v7 = vmul.f32 %v702_v30, %v484_v17  ;;  %v315_v38 = vadd.f32 0.014752088, %v314_v3  ;;  %vm367_vm10 = vweird.f32 %v1019_v62 }
 0x1e6   :  { %v456_v36 = vmul.f32 %v455_v31, %v431_v12  ;;  %v371_v29 = vand.u32 2147483647, %v1019_v62  ;;  %v374_v24 = vor.u32 1.1754944e-38, %v373_v41  ;;  %v586_v48 = vadd.f32 1.0, %v669_v0  ;;  %vm1096_vm12 = vmor %vm367_vm10, %vm368_vm8 }
 0x1e7   :  { %v486_v37 = vadd.f32 %v702_v30, %v485_v7  ;;  %vm487_vm11 = vweird.f32 %v1039_v16  ;;  %v1100_v42 = vadd.f32 1.0, %v280_v11  ;;  %vm492_vm14 = vcmp.eq.f32.partialorder %v491_v59, 8.507059e+37 }
 0x1e8   :  { %v666_v13 = vclamps-f32 %v456_v36, 1.0  ;;  %vm489_vm13 = vmor %vm487_vm11, %vm488_vm9  ;;  %v494_v12 = vor.u32 1.1754944e-38, %v493_v4  ;;  %v370_v62 = vsel %vm1096_vm12, %v1056_v39, %v366_v32  ;;  %v594_v41 = vmul.f32 %v586_v48, %v1024_v28 }
 0x1e9   :  { %v490_v16 = vsel %vm489_vm13, %v702_v30, %v486_v37  ;;  %705 = vrcp.f32 %v1100_v42  ;;  %v316_v46 = vmul.f32 %v315_v38, %v919_v20  ;;  %v266_v51 = vadd.f32 0.05243302, %v1005_v34 }
 0x1ea   :  { %v704_v18 = vpop.eup %703  ;;  %v389_v47 = vmul.f32 %v1035_v10, %v891_v53  ;;  %v495_v61 = vsel %vm492_vm14, %v494_v12, %v490_v16  ;;  %vm372_vm15 = vcmp.eq.f32.partialorder %v371_v29, 8.507059e+37  ;;  %v599_v57 = vpack.c.bf16 %v594_v41, %v1059_v40 }
 0x1eb   :  { %v496_v52 = vmul.f32 %v495_v61, %v1049_v45  ;;  %v375_v39 = vsel %vm372_vm15, %v374_v24, %v370_v62  ;;  %v403_v28 = vmul.f32 %v704_v18, %v1081_v50  ;;  %v351_v54 = vmul.f32 %v1033_v21, %v850_v23 }
 0x1ec   :  { %v305_v14 = vmul.f32 %v1029_v9, %v919_v20  ;;  %v247_v34 = vmul.f32 0.5, %v901_v60  ;;  %v248_v55 = vmul.f32 0.5, %v922_v26  ;;  %614 = vmatpush.bf16.msra.mxu1 %v599_v57  ;;  %v583_v10 = vadd.f32 1.0, %v666_v13 }
 0x1ed   :  { %v667_v53 = vclamps-f32 %v496_v52, 1.0  ;;  %v404_v30 = vsub.f32 1.0, %v403_v28  ;;  %v317_v40 = vadd.f32 0.112945676, %v316_v46  ;;  %v390_v58 = vadd.f32 1.1283791, %v389_v47 }
 0x1ee   :  { %v376_v45 = vmul.f32 %v375_v39, %v351_v54  ;;  %v411_v59 = vand.u32 2147483647, %v1081_v50  ;;  %v413_v63 = vand.u32 2147483648, %v1081_v50  ;;  %vm408_vm0 = vweird.f32 %v704_v18 }
 0x1ef   :  { %v706_v1 = vpop.eup %705  ;;  %v584_v23 = vadd.f32 1.0, %v667_v53  ;;  %v405_v21 = vmul.f32 %v704_v18, %v404_v30  ;;  %v318_v9 = vmul.f32 %v317_v40, %v919_v20  ;;  %v267_v60 = vmul.f32 %v266_v51, %v886_v49 }
 0x1f0   :  { %v306_v26 = vadd.f32 0.05243302, %v305_v14  ;;  %vm407_vm1 = vweird.f32 %v1081_v50  ;;  %v283_v2 = vmul.f32 %v706_v1, %v1100_v42  ;;  %v591_v5 = vmul.f32 %v583_v10, %v247_v34 }
 0x1f1   :  { %v592_v3 = vmul.f32 %v584_v23, %v248_v55  ;;  %v406_v6 = vadd.f32 %v704_v18, %v405_v21  ;;  %v319_v8 = vadd.f32 0.4994258, %v318_v9  ;;  %v391_v4 = vmul.f32 %v390_v58, %v876_v43  ;;  %vm409_vm2 = vmor %vm407_vm1, %vm408_vm0 }
 0x1f2   :  { %vm412_vm3 = vcmp.eq.f32.partialorder %v411_v59, 8.507059e+37  ;;  %v414_v15 = vor.u32 1.1754944e-38, %v413_v63  ;;  %v284_v17 = vsub.f32 1.0, %v283_v2  ;;  %v664_v25 = vclamps-f32 %v376_v45, 1.0 }
 0x1f3   :  { %v598_v11 = vpack.c.bf16 %v592_v3, %v591_v5  ;;  %v410_v32 = vsel %vm409_vm2, %v704_v18, %v406_v6  ;;  %v320_v0 = vmul.f32 %v319_v8, %v919_v20  ;;  %v268_v31 = vadd.f32 0.18741608, %v267_v60 }
 0x1f4   :  { %v415_v7 = vsel %vm412_vm3, %v414_v15, %v410_v32  ;;  %v285_v50 = vmul.f32 %v706_v1, %v284_v17  ;;  %v307_v38 = vmul.f32 %v306_v26, %v919_v20  ;;  %v245_v24 = vmul.f32 0.5, %v843_v19  ;;  %v604_v26 = vpop.permute.xlu0 %603 }
 0x1f5   :  { %615 = vmatpush.bf16.msra.mxu1 %v598_v11  ;;  %v416_v36 = vmul.f32 %v415_v7, %v391_v4  ;;  %v321_v29 = vadd.f32 1.0, %v320_v0  ;;  %v581_v48 = vadd.f32 1.0, %v664_v25  ;;  %v269_v37 = vmul.f32 %v268_v31, %v886_v49 }
 0x1f6   :  { %v286_v35 = vadd.f32 %v706_v1, %v285_v50  ;;  %vm287_vm4 = vweird.f32 %v1100_v42  ;;  %vm288_vm5 = vweird.f32 %v706_v1  ;;  %v308_v13 = vadd.f32 0.18741608, %v307_v38 }
 0x1f7   :  { %v665_v43 = vclamps-f32 %v416_v36, 1.0  ;;  %707 = vrcp.f32 %v321_v29  ;;  %v246_v12 = vmul.f32 0.5, %v867_v33  ;;  %v293_v41 = vand.u32 2147483648, %v1100_v42  ;;  %vm289_vm6 = vmor %vm287_vm4, %vm288_vm5 }
 0x1f8   :  { %v291_v16 = vand.u32 2147483647, %v1100_v42  ;;  %v589_v46 = vmul.f32 %v581_v48, %v245_v24  ;;  %v270_v19 = vadd.f32 1.1283791, %v269_v37  ;;  %v290_v51 = vsel %vm289_vm6, %v706_v1, %v286_v35 }
 0x1f9   :  { %v582_v62 = vadd.f32 1.0, %v665_v43  ;;  %v309_v49 = vmul.f32 %v308_v13, %v919_v20  ;;  %v294_v57 = vor.u32 1.1754944e-38, %v293_v41  ;;  %vm327_vm8 = vweird.f32 %v321_v29 }
 0x1fa   :  { %vm292_vm7 = vcmp.eq.f32.partialorder %v291_v16, 8.507059e+37  ;;  %v271_v33 = vmul.f32 %v270_v19, %v860_v27  ;;  %v333_v42 = vand.u32 2147483648, %v321_v29  ;;  %v331_v55 = vand.u32 2147483647, %v321_v29 }
 0x1fb   :  { %v590_v18 = vmul.f32 %v582_v62, %v246_v12  ;;  %v295_v39 = vsel %vm292_vm7, %v294_v57, %v290_v51  ;;  %v310_v54 = vadd.f32 1.1283791, %v309_v49  ;;  %v243_v63 = vmul.f32 0.5, %v847_v22 }
 0x1fc   :  { %v296_v14 = vmul.f32 %v295_v39, %v271_v33  ;;  %v334_v10 = vor.u32 1.1754944e-38, %v333_v42  ;;  %vm332_vm11 = vcmp.eq.f32.partialorder %v331_v55, 8.507059e+37  ;;  %v244_v1 = vmul.f32 0.5, %v878_v44  ;;  %v709_v44 = vld [vmem:[%s1150_s0] sm:$0xff] }
 0x1fd   :  { %v708_v47 = vpop.eup %707  ;;  %v597_v61 = vpack.c.bf16 %v590_v18, %v589_v46  ;;  %v311_v20 = vmul.f32 %v310_v54, %v895_v56  ;;  %v595_v56 = vld [vmem:[%s1155_s5] sm:$0xf]  ;;  %vm606_vm12 = vcmask 523264  }
 0x1fe   :  { %v323_v52 = vmul.f32 %v708_v47, %v321_v29  ;;  %vm328_vm9 = vweird.f32 %v708_v47  ;;  %v662_v30 = vclamps-f32 %v296_v14, 1.0 }
 0x1ff   :  { %616 = vmatpush.bf16.msra.mxu1 %v597_v61  ;;  %vm329_vm10 = vmor %vm327_vm8, %vm328_vm9 }
 0x200   :  { %v324_v28 = vsub.f32 1.0, %v323_v52  ;;  %v579_v27 = vadd.f32 1.0, %v662_v30 }
 0x202   :  { %v325_v34 = vmul.f32 %v708_v47, %v324_v28  ;;  %v587_v21 = vmul.f32 %v579_v27, %v243_v63 }
 0x204   :  { %v326_v53 = vadd.f32 %v708_v47, %v325_v34 }
 0x206   :  { %v330_v40 = vsel %vm329_vm10, %v708_v47, %v326_v53 }
 0x207   :  { %v335_v58 = vsel %vm332_vm11, %v334_v10, %v330_v40 }
 0x208   :  { %v336_v45 = vmul.f32 %v335_v58, %v311_v20 }
 0x20a   :  { %v663_v59 = vclamps-f32 %v336_v45, 1.0 }
 0x20c   :  { %v580_v23 = vadd.f32 1.0, %v663_v59 }
 0x20e   :  { %v588_v9 = vmul.f32 %v580_v23, %v244_v1 }
 0x210   :  { %v596_v60 = vpack.c.bf16 %v588_v9, %v587_v21 }
 0x212   :  { %617 = vmatpush.bf16.msra.mxu1 %v596_v60 }
 0x215   :  { %670 = vmatmul.msk.bf16.vlgmr.msra.gmra.mxu1 %vm606_vm12, %v595_v56 }
 0x292   :  { %v619_v2 = vpop.f32.mrf.mxu1 }
 0x293   :  { %v620_v22 = vadd.f32 %v619_v2, %v604_v26 }
 0x295   :  { %v624_v5 = vadd.f32 %v709_v44, %v620_v22 }
 0x297   :  { %625 = vst.msk [vmem:[#allocation3] sm:$0xff] %vm606_vm12, %v624_v5 }
 0x298   :  { %636 = dma.vmem_to_hbm [thread:$0]  %s632_s2, 128, %s634_s11, [#allocation4]  }
 0x29a   :  { %v621_v3 = vpop.f32.mrf.mxu1 }
 0x29b   :  { %734 = dma.done.wait [#allocation4], 128  }
 0x29c   :  { %735 = vsyncadd [#allocation4], 4294967168 }
 0x29d   :  { %641 = vsyncpa [#allocation4], 1 }

</bundles_post_ra>
